<compile_context>
chip_gen: v6e
topology: v6e:2x2x1
jax: 0.10.0
libtpu: 0.0.40
codegen_flags: <defaults>
</compile_context>

<pallas_src>
import jax
import jax.numpy as jnp
from jax.experimental import pallas as pl
from jax.experimental.pallas import tpu as pltpu


_NEG = -1e30  # filler for padded vocab columns (exp(-1e30 - m) == 0)


def _round_up(x, m):
    return (x + m - 1) // m * m


def _choose_tiling(N, tile_n_max):
    """Pick (tile_n, N_pad), preferring N_pad == N (no padding, no output slice)
    and >= 2 grid tiles (so the parallel token axis can use both v7x cores)."""
    tile_n_max = max(8, (tile_n_max // 8) * 8)
    best_multi = 0
    for d in range(8, min(N, tile_n_max) + 1, 8):
        if N % d == 0 and N // d >= 2:
            best_multi = d                      # largest aligned divisor, >= 2 tiles
    if best_multi:
        return best_multi, N
    if N <= tile_n_max:
        return N, N                             # single full-extent tile (any N allowed)
    # Rare fallback: no sublane-aligned divisor -> pad rows; wrapper slices them off.
    return tile_n_max, _round_up(N, tile_n_max)


def _split_f32_to_bf16x3(t):
    """Exact 3-term bf16 split: hi + mid + lo == t bit-exactly (f32)."""
    hi = t.astype(jnp.bfloat16)
    r1 = t - hi.astype(jnp.float32)
    mid = r1.astype(jnp.bfloat16)
    lo = (r1 - mid.astype(jnp.float32)).astype(jnp.bfloat16)
    return jnp.stack([hi, mid, lo], axis=0)     # (3, V_pad, V_pad) bf16


def _gather_logits(idx_ref, table3_ref, out_shape):
    """Exact row gather table[idx] via one-hot @ bf16 pieces on the MXU.

    The one-hot (0/1) is exact in bf16, each DEFAULT-precision bf16 matmul
    gathers one piece exactly, and hi + mid + lo reconstructs the f32 table
    values bit-exactly (3 MXU passes vs. 9 for Precision.HIGHEST)."""
    tile_n, v = out_shape
    idx = idx_ref[...]                                            # (tile_n, 1) int32
    col = jax.lax.broadcasted_iota(jnp.int32, (tile_n, v), 1)     # (tile_n, V)
    onehot = (col == idx).astype(jnp.bfloat16)                    # (tile_n, V) bf16
    hi = jnp.dot(onehot, table3_ref[0], preferred_element_type=jnp.float32)
    mid = jnp.dot(onehot, table3_ref[1], preferred_element_type=jnp.float32)
    lo = jnp.dot(onehot, table3_ref[2], preferred_element_type=jnp.float32)
    return (hi + mid) + lo, col                                   # exact f32 gather


def bigram_gather_kernel(idx_ref, table3_ref, logits_ref):
    # Inference path: gather only, no cross-entropy work.
    logits, _ = _gather_logits(idx_ref, table3_ref, logits_ref.shape)
    logits_ref[...] = logits


def bigram_gather_loss_kernel(idx_ref, tgt_ref, table3_ref, logits_ref, nll_ref):
    # Training path: gather + masked per-tile NLL partial (mean done in wrapper).
    logits, col = _gather_logits(idx_ref, table3_ref, logits_ref.shape)
    logits_ref[...] = logits

    # Re-read from the VMEM ref: loss math streams from VMEM instead of forcing
    # the whole (tile_n, V) f32 value to stay live in vregs across the store.
    logits = logits_ref[...]

    tgt = tgt_ref[...]                                            # (tile_n, 1)
    valid = (tgt >= 0).astype(jnp.float32)                        # ignore_index == -1

    m = jnp.max(logits, axis=-1, keepdims=True)                   # (tile_n, 1)
    lse = m + jnp.log(jnp.sum(jnp.exp(logits - m), axis=-1, keepdims=True))
    picked = jnp.sum(jnp.where(col == tgt, logits, 0.0),
                     axis=-1, keepdims=True)                      # (tile_n, 1)

    partial = jnp.sum((lse - picked) * valid)                     # per-tile scalar

    # Lane-dense (8, 128) block; put the partial at [0, 0], zeros elsewhere so the
    # wrapper's jnp.sum(nll) directly yields the total masked NLL.
    r = jax.lax.broadcasted_iota(jnp.int32, nll_ref.shape, 0)
    c = jax.lax.broadcasted_iota(jnp.int32, nll_ref.shape, 1)
    nll_ref[...] = jnp.where((r == 0) & (c == 0), partial, 0.0)


def bigram_forward(idx, table, targets=None, tile_n_max=2048):
    """idx: (B, T) int, table: (V, V) float32, targets: optional (B, T) int.

    Returns (logits (B, T, V) float32, loss scalar or None)."""
    B, T = idx.shape
    V = table.shape[0]
    N = B * T

    V_pad = _round_up(max(V, 1), 128)
    tile_n, N_pad = _choose_tiling(N, tile_n_max)
    num_tiles = N_pad // tile_n

    idx_flat = idx.reshape(N).astype(jnp.int32)
    if N_pad != N:
        idx_flat = jnp.pad(idx_flat, (0, N_pad - N))
    idx_flat = idx_flat.reshape(N_pad, 1)

    t = table.astype(jnp.float32)
    if V_pad > V:
        t = jnp.pad(t, ((0, V_pad - V), (0, V_pad - V)))
        col_valid = (jnp.arange(V_pad) < V)[None, :]
        t = jnp.where(col_valid, t, _NEG)                 # padded cols drop out of LSE
    table3 = _split_f32_to_bf16x3(t)                      # (3, V_pad, V_pad) bf16

    tok_spec = pl.BlockSpec((tile_n, 1), lambda i: (i, 0))
    table_spec = pl.BlockSpec((3, V_pad, V_pad), lambda i: (0, 0, 0))  # VMEM-resident
    logits_spec = pl.BlockSpec((tile_n, V_pad), lambda i: (i, 0))
    nll_spec = pl.BlockSpec((8, 128), lambda i: (i, 0))

    # Working set: 2x logits block (double-buffered) + resident bf16 table + tokens.
    est_vmem = (2 * tile_n * V_pad * 4
                + 2 * 3 * V_pad * V_pad * 2
                + 4 * tile_n * 4
                + 2 * 8 * 128 * 4)
    cp_kwargs = dict(dimension_semantics=("parallel",))
    if est_vmem > (24 << 20):
        # Only kicks in for very large tiles/vocabularies; stay under v7x's 64 MiB.
        cp_kwargs["vmem_limit_bytes"] = min(2 * est_vmem, 60 << 20)
    compiler_params = pltpu.CompilerParams(**cp_kwargs)

    has_targets = targets is not None
    cost = pl.CostEstimate(
        flops=int(2 * N_pad * V_pad * V_pad * 3),
        transcendentals=int(N_pad * V_pad) if has_targets else 0,
        bytes_accessed=int(N_pad * V_pad * 4                 # logits writeback
                           + 3 * V_pad * V_pad * 2           # bf16 table pieces
                           + N_pad * 4 * (2 if has_targets else 1)
                           + num_tiles * 8 * 128 * 4))

    if not has_targets:
        logits_flat = pl.pallas_call(
            bigram_gather_kernel,
            out_shape=jax.ShapeDtypeStruct((N_pad, V_pad), jnp.float32),
            grid=(num_tiles,),
            in_specs=[tok_spec, table_spec],
            out_specs=logits_spec,
            compiler_params=compiler_params,
            cost_estimate=cost,
        )(idx_flat, table3)
        loss = None
    else:
        tgt_flat = targets.reshape(N).astype(jnp.int32)
        if N_pad != N:
            tgt_flat = jnp.pad(tgt_flat, (0, N_pad - N), constant_values=-1)
        tgt_flat = tgt_flat.reshape(N_pad, 1)

        logits_flat, nll = pl.pallas_call(
            bigram_gather_loss_kernel,
            out_shape=(jax.ShapeDtypeStruct((N_pad, V_pad), jnp.float32),
                       jax.ShapeDtypeStruct((num_tiles * 8, 128), jnp.float32)),
            grid=(num_tiles,),
            in_specs=[tok_spec, tok_spec, table_spec],
            out_specs=(logits_spec, nll_spec),
            compiler_params=compiler_params,
            cost_estimate=cost,
        )(idx_flat, tgt_flat, table3)
        # Mean over valid (!= -1) targets. All-ignored gives 0/0 = NaN, matching
        # torch.nn.functional.cross_entropy with ignore_index.
        count = jnp.sum((targets.reshape(-1) >= 0).astype(jnp.float32))
        loss = jnp.sum(nll) / count

    if N_pad == N and V_pad == V:
        logits = logits_flat.reshape(B, T, V)          # free bitcast, no extra HBM pass
    else:
        logits = logits_flat[:N, :V].reshape(B, T, V)  # only for non-aligned V / rare N fallback
    return logits, loss


if __name__ == "__main__":
    def reference(idx, table, targets=None):
        V = table.shape[0]
        logits = table[idx]
        if targets is None:
            return logits, None
        flat = logits.reshape(-1, V)
        tflat = targets.reshape(-1)
        lse = jax.scipy.special.logsumexp(flat, axis=-1)
        picked = flat[jnp.arange(flat.shape[0]), jnp.clip(tflat, 0, V - 1)]
        valid = (tflat >= 0).astype(jnp.float32)
        return logits, jnp.sum((lse - picked) * valid) / jnp.sum(valid)

    def check(B, T, V, seed, with_targets=True):
        k_tab, k_idx, k_tgt = jax.random.split(jax.random.PRNGKey(seed), 3)
        # full-mantissa values: exercises the exact 3x-bf16-split gather path
        table = (0.5 * jax.random.normal(k_tab, (V, V))).astype(jnp.float32)
        idx = jax.random.randint(k_idx, (B, T), 0, V, dtype=jnp.int32)
        targets = None
        if with_targets:
            targets = jax.random.randint(k_tgt, (B, T), 0, V, dtype=jnp.int32)
            targets = targets.at[0, 0].set(-1).at[B - 1, T // 2].set(-1)

        logits, loss = bigram_forward(idx, table, targets)
        jax.block_until_ready(logits)
        ref_logits, ref_loss = reference(idx, table, targets)

        assert jnp.allclose(logits, ref_logits, atol=1e-5, rtol=1e-5), (B, T, V)
        if with_targets:
            jax.block_until_ready(loss)
            assert jnp.allclose(loss, ref_loss, atol=1e-5, rtol=1e-5), (B, T, V)
        else:
            assert loss is None

    # deterministic inputs from jax.random.PRNGKey(seed) inside check()
    check(2, 8, 128, seed=0)                       # original toy config (N=16 -> 2x8 tiles)
    check(4, 640, 128, seed=1)                     # N=2560 -> 2x1280 tiles, no padding/slice
    check(3, 5, 27, seed=2)                        # vocab not lane-aligned; N=15 single full tile
    check(8, 256, 128, seed=3)                     # N=2048 -> 2x1024 tiles, even split
    check(2, 8, 128, seed=4, with_targets=False)   # inference path (gather-only kernel)

    print("KERNEL_OK")
</pallas_src>

<mosaic_0001>
module attributes {stable_mosaic.version = 11 : i64} {
  func.func @bigram_gather_loss_kernel(%arg0: i32, %arg1: memref<8x1xi32, #tpu.memory_space<vmem>>, %arg2: memref<8x1xi32, #tpu.memory_space<vmem>>, %arg3: memref<3x128x128xbf16, #tpu.memory_space<vmem>>, %arg4: memref<8x128xf32, #tpu.memory_space<vmem>>, %arg5: memref<8x128xf32, #tpu.memory_space<vmem>>) attributes {dimension_semantics = [#tpu.dimension_semantics<parallel>], iteration_bounds = array<i64: 2>, scalar_prefetch = 0 : i64, scratch_operands = 0 : i64, tpu.core_type = #tpu.core_type<tc>, window_params = [{transform_indices = @transform_0, window_bounds = array<i64: 8, 1>}, {transform_indices = @transform_1, window_bounds = array<i64: 8, 1>}, {pipeline_mode = #tpu.pipeline_mode<synchronous>, transform_indices = @transform_2, window_bounds = array<i64: 3, 128, 128>}, {transform_indices = @transform_3, window_bounds = array<i64: 8, 128>}, {transform_indices = @transform_4, window_bounds = array<i64: 8, 128>}]} {
    %c0 = arith.constant 0 : index
    %c0_0 = arith.constant 0 : index
    %0 = vector.load %arg1[%c0, %c0_0] : memref<8x1xi32, #tpu.memory_space<vmem>>, vector<8x1xi32>
    %1 = tpu.iota {dimensions = array<i32: 1>} : vector<8x128xi32>
    %2 = vector.broadcast %0 : vector<8x1xi32> to vector<8x128xi32>
    %3 = arith.cmpi eq, %1, %2 : vector<8x128xi32>
    %4 = arith.extui %3 : vector<8x128xi1> to vector<8x128xi32>
    %5 = arith.sitofp %4 : vector<8x128xi32> to vector<8x128xf32>
    %6 = arith.truncf %5 : vector<8x128xf32> to vector<8x128xbf16>
    %c0_1 = arith.constant 0 : index
    %c0_2 = arith.constant 0 : index
    %c0_3 = arith.constant 0 : index
    %7 = vector.load %arg3[%c0_1, %c0_2, %c0_3] : memref<3x128x128xbf16, #tpu.memory_space<vmem>>, vector<1x128x128xbf16>
    %8 = vector.shape_cast %7 : vector<1x128x128xbf16> to vector<128x128xbf16>
    %cst = arith.constant dense<0.000000e+00> : vector<8x128xf32>
    %9 = tpu.matmul %6, %8, %cst {dimension_numbers = #tpu.dot_dimension_numbers<[1], [0], [0], [1], [0, 0, 1, 1], [], []>} : vector<8x128xbf16>, vector<128x128xbf16>, vector<8x128xf32> -> vector<8x128xf32>
    %c1 = arith.constant 1 : index
    %c0_4 = arith.constant 0 : index
    %c0_5 = arith.constant 0 : index
    %10 = vector.load %arg3[%c1, %c0_4, %c0_5] : memref<3x128x128xbf16, #tpu.memory_space<vmem>>, vector<1x128x128xbf16>
    %11 = vector.shape_cast %10 : vector<1x128x128xbf16> to vector<128x128xbf16>
    %cst_6 = arith.constant dense<0.000000e+00> : vector<8x128xf32>
    %12 = tpu.matmul %6, %11, %cst_6 {dimension_numbers = #tpu.dot_dimension_numbers<[1], [0], [0], [1], [0, 0, 1, 1], [], []>} : vector<8x128xbf16>, vector<128x128xbf16>, vector<8x128xf32> -> vector<8x128xf32>
    %c2 = arith.constant 2 : index
    %c0_7 = arith.constant 0 : index
    %c0_8 = arith.constant 0 : index
    %13 = vector.load %arg3[%c2, %c0_7, %c0_8] : memref<3x128x128xbf16, #tpu.memory_space<vmem>>, vector<1x128x128xbf16>
    %14 = vector.shape_cast %13 : vector<1x128x128xbf16> to vector<128x128xbf16>
    %cst_9 = arith.constant dense<0.000000e+00> : vector<8x128xf32>
    %15 = tpu.matmul %6, %14, %cst_9 {dimension_numbers = #tpu.dot_dimension_numbers<[1], [0], [0], [1], [0, 0, 1, 1], [], []>} : vector<8x128xbf16>, vector<128x128xbf16>, vector<8x128xf32> -> vector<8x128xf32>
    %16 = arith.addf %9, %12 : vector<8x128xf32>
    %17 = arith.addf %16, %15 : vector<8x128xf32>
    %c0_10 = arith.constant 0 : index
    %c0_11 = arith.constant 0 : index
    %18 = vector.load %arg4[%c0_10, %c0_11] : memref<8x128xf32, #tpu.memory_space<vmem>>, vector<8x128xf32>
    tpu.vector_store %arg4[%c0_10, %c0_11], %17 {strides = array<i32>} : memref<8x128xf32, #tpu.memory_space<vmem>>, vector<8x128xf32>,
    %c0_12 = arith.constant 0 : index
    %c0_13 = arith.constant 0 : index
    %19 = vector.load %arg4[%c0_12, %c0_13] : memref<8x128xf32, #tpu.memory_space<vmem>>, vector<8x128xf32>
    %c0_14 = arith.constant 0 : index
    %c0_15 = arith.constant 0 : index
    %20 = vector.load %arg2[%c0_14, %c0_15] : memref<8x1xi32, #tpu.memory_space<vmem>>, vector<8x1xi32>
    %c0_i32 = arith.constant 0 : i32
    %21 = vector.broadcast %c0_i32 : i32 to vector<8x1xi32>
    %22 = arith.cmpi sge, %20, %21 : vector<8x1xi32>
    %23 = arith.extui %22 : vector<8x1xi1> to vector<8x1xi32>
    %24 = arith.sitofp %23 : vector<8x1xi32> to vector<8x1xf32>
    %cst_16 = arith.constant dense<0xFF800000> : vector<8xf32>
    %25 = vector.multi_reduction <maximumf>, %19, %cst_16 [1] : vector<8x128xf32> to vector<8xf32>
    %26 = vector.shape_cast %25 : vector<8xf32> to vector<8x1xf32>
    %27 = vector.broadcast %26 : vector<8x1xf32> to vector<8x128xf32>
    %28 = arith.subf %19, %27 : vector<8x128xf32>
    %29 = math.exp %28 : vector<8x128xf32>
    %cst_17 = arith.constant dense<0.000000e+00> : vector<8xf32>
    %30 = vector.multi_reduction <add>, %29, %cst_17 [1] : vector<8x128xf32> to vector<8xf32>
    %31 = vector.shape_cast %30 : vector<8xf32> to vector<8x1xf32>
    %32 = math.log %31 : vector<8x1xf32>
    %33 = arith.addf %26, %32 : vector<8x1xf32>
    %34 = vector.broadcast %20 : vector<8x1xi32> to vector<8x128xi32>
    %35 = arith.cmpi eq, %1, %34 : vector<8x128xi32>
    %cst_18 = arith.constant 0.000000e+00 : f32
    %36 = vector.broadcast %cst_18 : f32 to vector<8x128xf32>
    %37 = arith.select %35, %19, %36 : vector<8x128xi1>, vector<8x128xf32>
    %cst_19 = arith.constant dense<0.000000e+00> : vector<8xf32>
    %38 = vector.multi_reduction <add>, %37, %cst_19 [1] : vector<8x128xf32> to vector<8xf32>
    %39 = vector.shape_cast %38 : vector<8xf32> to vector<8x1xf32>
    %40 = arith.subf %33, %39 : vector<8x1xf32>
    %41 = arith.mulf %40, %24 : vector<8x1xf32>
    %42 = vector.shape_cast %41 : vector<8x1xf32> to vector<1x8x1xf32>
    %cst_20 = arith.constant dense<0.000000e+00> : vector<1xf32>
    %43 = vector.multi_reduction <add>, %42, %cst_20 [1, 2] : vector<1x8x1xf32> to vector<1xf32>
    %44 = vector.shape_cast %43 : vector<1xf32> to vector<1x1x1xf32>
    %45 = vector.extract %44[0, 0, 0] : f32 from vector<1x1x1xf32>
    %46 = tpu.iota {dimensions = array<i32: 0>} : vector<8x128xi32>
    %47 = tpu.iota {dimensions = array<i32: 1>} : vector<8x128xi32>
    %c0_i32_21 = arith.constant 0 : i32
    %48 = vector.broadcast %c0_i32_21 : i32 to vector<8x128xi32>
    %49 = arith.cmpi eq, %46, %48 : vector<8x128xi32>
    %c0_i32_22 = arith.constant 0 : i32
    %50 = vector.broadcast %c0_i32_22 : i32 to vector<8x128xi32>
    %51 = arith.cmpi eq, %47, %50 : vector<8x128xi32>
    %52 = arith.andi %49, %51 : vector<8x128xi1>
    %cst_23 = arith.constant 0.000000e+00 : f32
    %53 = vector.broadcast %45 : f32 to vector<8x128xf32>
    %54 = vector.broadcast %cst_23 : f32 to vector<8x128xf32>
    %55 = arith.select %52, %53, %54 : vector<8x128xi1>, vector<8x128xf32>
    %c0_24 = arith.constant 0 : index
    %c0_25 = arith.constant 0 : index
    %56 = vector.load %arg5[%c0_24, %c0_25] : memref<8x128xf32, #tpu.memory_space<vmem>>, vector<8x128xf32>
    tpu.vector_store %arg5[%c0_24, %c0_25], %55 {strides = array<i32>} : memref<8x128xf32, #tpu.memory_space<vmem>>, vector<8x128xf32>,
    return
  }
  func.func @transform_0(%arg0: i32) -> (i32, i32) {
    %c0_i32 = arith.constant 0 : i32
    %c0_i32_0 = arith.constant 0 : i32
    return %arg0, %c0_i32 : i32, i32
  }
  func.func @transform_1(%arg0: i32) -> (i32, i32) {
    %c0_i32 = arith.constant 0 : i32
    %c0_i32_0 = arith.constant 0 : i32
    return %arg0, %c0_i32 : i32, i32
  }
  func.func @transform_2(%arg0: i32) -> (i32, i32, i32) {
    %c0_i32 = arith.constant 0 : i32
    %c0_i32_0 = arith.constant 0 : i32
    %c0_i32_1 = arith.constant 0 : i32
    %c0_i32_2 = arith.constant 0 : i32
    return %c0_i32, %c0_i32_0, %c0_i32_1 : i32, i32, i32
  }
  func.func @transform_3(%arg0: i32) -> (i32, i32) {
    %c0_i32 = arith.constant 0 : i32
    %c0_i32_0 = arith.constant 0 : i32
    return %arg0, %c0_i32 : i32, i32
  }
  func.func @transform_4(%arg0: i32) -> (i32, i32) {
    %c0_i32 = arith.constant 0 : i32
    %c0_i32_0 = arith.constant 0 : i32
    return %arg0, %c0_i32 : i32, i32
  }
}

</mosaic_0001>

<bundles_post_ra>
// kernel: tpu_custom_call.1
= control target key start
LH: loop header
LB: loop body
LE: loop exit
PB: predicated region body
PF: predicated region fallthrough
CT: control target
= control target key end

     0   :  { %10 = vsyncpa [#allocation3], 0  ;;  %s1338_s0 = inlined_call_operand.vmem [shape: s32[16,1], index: 0, kind: input, shape index: {}]   ;;  %s1339_s1 = inlined_call_operand.vmem [shape: s32[16,1], index: 1, kind: input, shape index: {}]   ;;  %s1340_s2 = inlined_call_operand.hbm [shape: bf16[3,128,128], index: 2, kind: input, shape index: {}]   ;;  %s1341_s3 = inlined_call_operand.hbm [shape: f32[16,128], index: 3, kind: output, shape index: {0}]   ;;  %s1342_s4 = inlined_call_operand.hbm [shape: f32[16,128], index: 4, kind: output, shape index: {1}]  }
   0x1   :  { %11 = vsyncpa [#allocation4], 0 }
   0x2   :  { %13 = vsyncpa [#allocation4 + $0x1], 0 }
   0x3   :  { %14 = vsyncpa [#allocation7], 0 }
   0x4   :  { %16 = vsyncpa [#allocation7 + $0x1], 0  ;;  %s1137_s15 = smov 0   ;;  %s1139_s16 = smov 0  }
   0x5   :  { %s1141_s17 = smov 0   ;;  %s1143_s18 = smov 0  }
   0x6 LB: > { %s1158_s19 = sadd.s32 4294967295, %s1101_s18   ;;  %s753_s20 = sadd.s32 4294967294, %s1101_s18   ;;  %s1101_s18 = sphi %s1143_s18, %s1352_s18   ;;  %s1097_s17 = sphi %s1141_s17, %s1351_s17   ;;  %s1093_s16 = sphi %s1139_s16, %s1350_s16   ;;  %s1089_s15 = sphi %s1137_s15, %s1349_s15  }
   0x7   : > { %s1162_s21 = sadd.s32 1, %s1101_s18   ;;  %s102_s22 = sadd.s32 1, %s1097_s17 }
   0x8   : > { %s99_s23 = ssub.s32 %s1101_s18, %s1162_s21  ;;  %p112_p0 = scmp.ne.s32.totalorder %s1097_s17, %s1093_s16 }
   0x9   : > { %p100_p1 = scmp.eq.s32.totalorder %s99_s23, 0  ;;  %p113_p2 = scmp.eq.s32.totalorder %s1158_s19, 1 }
   0xa   : > { %p118_p3 = scmp.ne.s32.totalorder %s1093_s16, %s1089_s15  ;;  %p119_p4 = scmp.eq.s32.totalorder %s753_s20, 1 }
   0xb   : > { %s1173_s24 = scalar_select %p100_p1, %s1097_s17, %s102_s22  }
   0xc   : > { %p1175_p5 = por %p113_p2, %p112_p0  ;;  %p1179_p6 = por %p119_p4, %p118_p3 }
   0xd   : > { %p754_p7 = scmp.ge.s32.totalorder %s1101_s18, 1  ;;  %p152_p8 = scmp.lt.s32.totalorder %s1101_s18, 3 }
   0xe   : > { %s1344_s26 = scalar_select %p1179_p6, 1, 0 }
   0xf   : > { %p909_p9 = scmp.eq.s32.totalorder %s1158_s19, 0  ;;  %p1186_p10 = pnand %p754_p7, %p152_p8 }
  0x10   : > { %s1103_s28 = smov [#allocation2]  }
  0x11   : > { %s164_s29 = sshll.u32 %s1103_s28, 4  ;;  %p898_p11 = pneg %p1186_p10  ;;  %s165_s29 = int_to_ptr.vmem [resolvable:$true] %s164_s29 }
  0x12   : > { %s992_s30 = scalar_lea.vmem %s165_s29, 3072  ;;  %p1000_p3 = scmp.lt.s32.totalorder %s165_s29, %s165_s29 }
  0x13   : > { %p899_p12 = pnand %p909_p9, %p898_p11  ;;  %p993_p0 = scmp.ne.s32.totalorder %s165_s29, %s992_s30 }
  0x14   : > { %p1001_p4 = scmp.lt.s32.totalorder %s992_s30, %s992_s30 }
  0x15   : > { %p983_p13 = pneg %p899_p12 }
  0x16   : > { %p1002_p6 = por %p1001_p4, %p1000_p3 }
  0x17   : > { %p995_p1 = pnand %p993_p0, %p983_p13 }
  0x19   : > { %p996_p2 = pneg %p995_p1 }
  0x1b   : > { %p1003_p7 = pnand %p1002_p6, %p996_p2 }
  0x1d   : > { %1006 = shalt.err (!%p1003_p7)
}
  0x1e   : > { %s1104_s5 = smov 64   ;;  %s1105_s6 = smov 4  }
  0x1f   : > { %901 = dma.hbm_to_vmem [thread:$0]  (!%p899_p12), %s1340_s2, 3072, %s165_s29, [#allocation3], %s1104_s5, %s1104_s5, %s1105_s6  }
  0x20   : > { %194 = sbr.rel (%p1186_p10) target bundleno = 932 (0x3a4), region = 32 }
  0x25   : > { %1076 = dma.done.wait (%p909_p9), [#allocation3], 3072  }
  0x26   : > { %1078 = vsyncadd (%p909_p9), [#allocation3], 4294964224  ;;  %p228_p8 = scmp.lt.s32.totalorder %s1158_s19, 1  ;;  %v1106_v0 = vmov 0   ;;  %v1107_v1 = vmov 0.0   ;;  %vm1108_vm0 = vmmov 0   ;;  %v238_v20 = vlaneseq }
  0x27   : > { %951 = vset.pattern.permute.xlu0 %v1106_v0  ;;  %828 = vmatprep.subr.bf16.mxu0 %v1107_v1  ;;  %v953_v3 = vld [vmem:[#allocation2 + $0x78] sm:$0xff]   ;;  %v955_v5 = vld [vmem:[#allocation2 + $0x70] sm:$0xff]   ;;  %v957_v7 = vld [vmem:[#allocation2 + $0x68] sm:$0xff]   ;;  %v1109_v25 = vmov 1.0|1.0   ;;  %s1266_s23 = sand.u32 1, %s1093_s16  }
  0x28   : > { %s1206_s9 = scalar_select %p228_p8, %s1158_s19, 1  ;;  %848 = vmatprep.subr.bf16.mxu1 %v1107_v1  ;;  %952 = vset.pattern.permute.xlu1 %v1106_v0  ;;  %v954_v4 = vld [vmem:[#allocation2 + $0xb8] sm:$0xff]   ;;  %v956_v6 = vld [vmem:[#allocation2 + $0xb0] sm:$0xff]   ;;  %v958_v8 = vld [vmem:[#allocation2 + $0xa8] sm:$0xff]   ;;  %v1243_v21 = vand.u32 127, %v238_v20  ;;  %vm587_vm5 = vcmask 7168  }
  0x29   : > { %844 = vmatprep.mubr.msk.bf16.mxu0 %vm1108_vm0, %v1107_v1  ;;  %864 = vmatprep.mubr.msk.bf16.mxu1 %vm1108_vm0, %v1107_v1  ;;  %v959_v9 = vld [vmem:[#allocation2 + $0x60] sm:$0xff]   ;;  %v961_v11 = vld [vmem:[#allocation2 + $0x58] sm:$0xff]   ;;  %v963_v13 = vld [vmem:[#allocation2 + $0x50] sm:$0xff]   ;;  %s759_s27 = sshll.u32 %s1266_s23, 3  ;;  %s797_s29 = sshll.u32 %s1158_s19, 7 }
  0x2a   : > { %s761_s10 = sshll.u32 %s1206_s9, 3  ;;  %829 = vmatpush3.bf16.msra.mxu0 %v953_v3  ;;  %849 = vmatpush3.bf16.msra.mxu1 %v954_v4  ;;  %v960_v10 = vld [vmem:[#allocation2 + $0xa0] sm:$0xff]   ;;  %v962_v12 = vld [vmem:[#allocation2 + $0x98] sm:$0xff]   ;;  %v964_v14 = vld [vmem:[#allocation2 + $0x90] sm:$0xff]   ;;  %s220_s28 = scalar_lea.vmem [#allocation5], %s759_s27 }
  0x2b   : > { %s231_s13 = scalar_lea.vmem %s1338_s0, %s761_s10  ;;  %830 = vmatprep.subr.bf16.mxu0 %v1107_v1  ;;  %850 = vmatprep.subr.bf16.mxu1 %v1107_v1  ;;  %v965_v15 = vld [vmem:[#allocation2 + $0x48] sm:$0xff]   ;;  %v967_v17 = vld [vmem:[#allocation2 + $0x40] sm:$0xff]   ;;  %s235_s22 = scalar_lea.vmem %s1339_s1, %s761_s10  ;;  %v969_v23 = vld [vmem:[#allocation2 + $0x38] sm:$0xff]  }
  0x2c   : > { %v237_v2 = vld [vmem:[%s231_s13] sm:$0xff]  ;;  %v966_v16 = vld [vmem:[#allocation2 + $0x88] sm:$0xff]   ;;  %v970_v26 = vld [vmem:[#allocation2 + $0x30] sm:$0xff]   ;;  %s625_s30 = sshll.u32 %s220_s28, 4  ;;  %s623_s7 = scalar_lea.hbm %s1341_s3, %s797_s29  ;;  %s626_s30 = int_to_ptr.vmem [resolvable:$true] %s625_s30 }
  0x2d   : > { %241 = vperm.xlu0 %951, %v237_v2   ;;  %v968_v18 = vld [vmem:[#allocation2 + $0x80] sm:$0xff]   ;;  %v971_v27 = vld [vmem:[#allocation2 + $0x28] sm:$0xff]   ;;  %v973_v29 = vld [vmem:[#allocation2 + $0x18] sm:$0xff]   ;;  %s607_s8 = scalar_lea.sflag [#allocation4], %s1266_s23  ;;  %s1007_s9 = scalar_lea.vmem %s626_s30, 128 }
  0x2e   : > { %831 = vmatpush3.bf16.msra.mxu0 %v955_v5  ;;  %851 = vmatpush3.bf16.msra.mxu1 %v956_v6  ;;  %v1239_v19 = vld [vmem:[%s235_s22] sm:$0xff]  ;;  %v974_v30 = vld [vmem:[#allocation2 + $0x10] sm:$0xff]   ;;  %v975_v31 = vld [vmem:[#allocation2 + $0x8] sm:$0xff]   ;;  %p1008_p6 = scmp.ne.s32.totalorder %s626_s30, %s1007_s9  ;;  %s1110_s10 = smov [#allocation5]  }
  0x2f   : > { %832 = vmatprep.subr.bf16.mxu0 %v1107_v1  ;;  %852 = vmatprep.subr.bf16.mxu1 %v1107_v1  ;;  %v972_v28 = vld [vmem:[#allocation2 + $0x20] sm:$0xff]   ;;  %vm565_vm4 = vcmp.ge.s32.totalorder %v1239_v19, 0  ;;  %s1011_s11 = sshll.u32 %s1110_s10, 4  ;;  %s1012_s11 = int_to_ptr.vmem [resolvable:$false] %s1011_s11 }
  0x30   : > { %579 = vperm.xlu1 %952, %v1239_v19   ;;  %v976_v32 = vld [vmem:[#allocation2] sm:$0xff]   ;;  %v794_v57 = vsel %vm565_vm4, 1.0, %v1107_v1  ;;  %p1009_p9 = pnand %p1008_p6, %p1175_p5  ;;  %s1013_s12 = scalar_lea.vmem %s1012_s11, 256 }
  0x31   : > { %p1014_p11 = scmp.lt.s32.totalorder %s626_s30, %s1012_s11  ;;  %p1015_p12 = scmp.lt.s32.totalorder %s1013_s12, %s1007_s9 }
  0x32   : > { %833 = vmatpush3.bf16.msra.mxu0 %v957_v7  ;;  %853 = vmatpush3.bf16.msra.mxu1 %v958_v8  ;;  %p1010_p10 = pneg %p1009_p9 }
  0x33   : > { %834 = vmatprep.subr.bf16.mxu0 %v1107_v1  ;;  %854 = vmatprep.subr.bf16.mxu1 %v1107_v1  ;;  %p1016_p13 = por %p1015_p12, %p1014_p11 }
  0x35   : > { %p1017_p0 = pnand %p1016_p13, %p1010_p10 }
  0x36   : > { %835 = vmatpush3.bf16.msra.mxu0 %v959_v9  ;;  %855 = vmatpush3.bf16.msra.mxu1 %v960_v10 }
  0x37   : > { %836 = vmatprep.subr.bf16.mxu0 %v1107_v1  ;;  %856 = vmatprep.subr.bf16.mxu1 %v1107_v1 }
  0x3a   : > { %837 = vmatpush3.bf16.msra.mxu0 %v961_v11  ;;  %857 = vmatpush3.bf16.msra.mxu1 %v962_v12 }
  0x3b   : > { %838 = vmatprep.subr.bf16.mxu0 %v1107_v1  ;;  %858 = vmatprep.subr.bf16.mxu1 %v1107_v1 }
  0x3e   : > { %839 = vmatpush3.bf16.msra.mxu0 %v963_v13  ;;  %859 = vmatpush3.bf16.msra.mxu1 %v964_v14 }
  0x3f   : > { %840 = vmatprep.subr.bf16.mxu0 %v1107_v1  ;;  %860 = vmatprep.subr.bf16.mxu1 %v1107_v1 }
  0x42   : > { %841 = vmatpush3.bf16.msra.mxu0 %v965_v15  ;;  %861 = vmatpush3.bf16.msra.mxu1 %v966_v16 }
  0x43   : > { %842 = vmatprep.subr.bf16.mxu0 %v1107_v1  ;;  %862 = vmatprep.subr.bf16.mxu1 %v1107_v1 }
  0x46   : > { %843 = vmatpush3.bf16.msra.mxu0 %v967_v17  ;;  %863 = vmatpush3.bf16.msra.mxu1 %v968_v18 }
  0x47   : > { %868 = vmatprep.subr.bf16.mxu0 %v1107_v1 }
  0xa8   : > { %v242_v22 = vpop.permute.xlu0 %241 }
  0xa9   : > { %vm243_vm1 = vcmp.eq.s32.totalorder %v1243_v21, %v242_v22 }
  0xaa   : > { %vm1246_vm2 = vmpackc.low %vm243_vm1, %vm243_vm1 }
  0xab   : > { %845 = vmatmul.mubr.msk.bf16.vlgmr.msra.gmra.mxu0 %vm1246_vm2, %v1109_v25  ;;  %865 = vmatmul.mubr.msk.bf16.vlgmr.msra.gmra.mxu1 %vm1246_vm2, %v1109_v25  ;;  %v580_v44 = vpop.permute.xlu1 %579 }
  0xac   : > { %869 = vmatpush3.bf16.msra.mxu0 %v969_v23  ;;  %884 = vmatprep.mubr.msk.bf16.mxu0 %vm1108_vm0, %v1107_v1  ;;  %vm581_vm3 = vcmp.eq.s32.totalorder %v1243_v21, %v580_v44 }
  0xad   : > { %870 = vmatprep.subr.bf16.mxu0 %v1107_v1 }
  0xb0   : > { %871 = vmatpush3.bf16.msra.mxu0 %v970_v26 }
  0xb1   : > { %872 = vmatprep.subr.bf16.mxu0 %v1107_v1 }
  0xb4   : > { %873 = vmatpush3.bf16.msra.mxu0 %v971_v27 }
  0xb5   : > { %874 = vmatprep.subr.bf16.mxu0 %v1107_v1 }
  0xb8   : > { %875 = vmatpush3.bf16.msra.mxu0 %v972_v28 }
  0xb9   : > { %876 = vmatprep.subr.bf16.mxu0 %v1107_v1 }
  0xbc   : > { %877 = vmatpush3.bf16.msra.mxu0 %v973_v29 }
  0xbd   : > { %878 = vmatprep.subr.bf16.mxu0 %v1107_v1 }
  0xc0   : > { %879 = vmatpush3.bf16.msra.mxu0 %v974_v30 }
  0xc1   : > { %880 = vmatprep.subr.bf16.mxu0 %v1107_v1 }
  0xc4   : > { %881 = vmatpush3.bf16.msra.mxu0 %v975_v31 }
  0xc5   : > { %882 = vmatprep.subr.bf16.mxu0 %v1107_v1 }
  0xc8   : > { %883 = vmatpush3.bf16.msra.mxu0 %v976_v32 }
  0xcb   : > { %885 = vmatmul.mubr.msk.bf16.vlgmr.msra.gmra.mxu0 %vm1246_vm2, %v1109_v25 }
 0x16b   : > { %v362_v33 = vpop.f32.mrf.mxu0  ;;  %v467_v34 = vpop.f32.mrf.mxu1 }
 0x16d   : > { %v846_v35 = vpop.f32.mrf.mxu0  ;;  %v866_v36 = vpop.f32.mrf.mxu1 }
 0x16f   : > { %v365_v37 = vpop.f32.mrf.mxu0  ;;  %v470_v38 = vpop.f32.mrf.mxu1 }
 0x171   : > { %v847_v39 = vpop.f32.mrf.mxu0  ;;  %v867_v40 = vpop.f32.mrf.mxu1 }
 0x18b   : > { %v555_v41 = vpop.f32.mrf.mxu0 }
 0x18c   : > { %v556_v42 = vadd.f32 %v555_v41, %v362_v33 }
 0x18d   : > { %v886_v43 = vpop.f32.mrf.mxu0 }
 0x18e   : > { %v561_v45 = vadd.f32 %v556_v42, %v467_v34 }
 0x18f   : > { %v558_v46 = vpop.f32.mrf.mxu0 }
 0x190   : > { %562 = vst [vmem:[%s220_s28] sm:$0xff] %v561_v45  ;;  %568 = vmax.xlane.f32.xlu0 %v561_v45  ;;  %v582_v48 = vsel %vm581_vm3, %v561_v45, 0.0 }
 0x191   : > { %v887_v47 = vpop.f32.mrf.mxu0 }
 0x194   : > { %583 = vadd.xlane.f32.xlu0 %v582_v48 }
 0x219   : > { %v569_v49 = vpop.xlane.xlu0 %568 }
 0x21a   : > { %v570_v50 = vsub.f32 %v561_v45, %v569_v49 }
 0x21c   : > { %v571_v51 = vmul.f32 1.442695, %v570_v50 }
 0x21d   : > { %v584_v58 = vpop.xlane.xlu0 %583 }
 0x21e   : > { %977 = vpow2.f32 %v571_v51 }
 0x22b   : > { %v978_v52 = vpop.eup %977 }
 0x22c   : > { %573 = vadd.xlane.f32.xlu1 %v978_v52 }
 0x2b5   : > { %v574_v53 = vpop.xlane.xlu1 %573 }
 0x2b6   : > { %979 = vlog2.f32 %v574_v53 }
 0x2c3   : > { %v980_v54 = vpop.eup %979 }
 0x2c4   : > { %v576_v55 = vmul.f32 0.6931472, %v980_v54 }
 0x2c6   : > { %v577_v56 = vadd.f32 %v576_v55, %v569_v49 }
 0x2c8   : > { %v585_v59 = vsub.f32 %v577_v56, %v584_v58 }
 0x2ca   : > { %v586_v60 = vmul.f32 %v794_v57, %v585_v59 }
 0x2cc   : > { %v588_v61 = vsel %vm587_vm5, %v586_v60, 0.0 }
 0x2cd   : > { %589 = vadd.xlane.f32.xlu0 %v588_v61 }
 0x2ce   : > { %1020 = shalt.err (!%p1017_p0)
}
 0x2cf   : > { %s1021_s13 = scalar_lea.hbm %s623_s7, 128  ;;  %s1025_s22 = scalar_lea.hbm %s1341_s3, 256 }
 0x2d0   : > { %p1022_p1 = scmp.ne.s32.totalorder %s623_s7, %s1021_s13  ;;  %p1026_p4 = scmp.lt.s32.totalorder %s623_s7, %s1341_s3 }
 0x2d1   : > { %p1027_p7 = scmp.lt.s32.totalorder %s1025_s22, %s1021_s13 }
 0x2d2   : > { %p1023_p2 = pnand %p1022_p1, %p1175_p5 }
 0x2d3   : > { %p1028_p8 = por %p1027_p7, %p1026_p4 }
 0x2d4   : > { %p1024_p3 = pneg %p1023_p2 }
 0x2d6   : > { %p1029_p6 = pnand %p1028_p8, %p1024_p3 }
 0x2d8   : > { %1032 = shalt.err (!%p1029_p6)
}
 0x2d9   : > { %894 = dma.vmem_to_hbm [thread:$0]  (%p1175_p5), %s626_s30, 128, %s623_s7, %s607_s8   ;;  %v599_v5 = vshrl.u32 %v238_v20, 7  ;;  %vm601_vm7 = vcmp.eq.s32.totalorder %v1243_v21, 0 }
 0x2da   : > { %s227_s6 = scalar_lea.vmem [#allocation6], %s759_s27  ;;  %s1302_s10 = scalar_lea.hbm %s1342_s4, %s797_s29 }
 0x2db   : > { %vm600_vm6 = vcmp.eq.s32.totalorder %v599_v5, 0  ;;  %s638_s9 = sshll.u32 %s227_s6, 4  ;;  %s612_s11 = scalar_lea.sflag [#allocation7], %s1266_s23  ;;  %s639_s9 = int_to_ptr.vmem [resolvable:$true] %s638_s9 }
 0x2dc   : > { %vm602_vm8 = vmand %vm600_vm6, %vm601_vm7  ;;  %s1033_s12 = scalar_lea.vmem %s639_s9, 128  ;;  %s1111_s27 = smov [#allocation6]  }
 0x2dd   : > { %p1034_p9 = scmp.ne.s32.totalorder %s639_s9, %s1033_s12  ;;  %s1037_s13 = sshll.u32 %s1111_s27, 4  ;;  %s1038_s13 = int_to_ptr.vmem [resolvable:$false] %s1037_s13 }
 0x2de   : > { %s1039_s14 = scalar_lea.vmem %s1038_s13, 256  ;;  %p1040_p12 = scmp.lt.s32.totalorder %s639_s9, %s1038_s13 }
 0x2df   : > { %p1035_p10 = pnand %p1034_p9, %p1175_p5  ;;  %p1041_p13 = scmp.lt.s32.totalorder %s1039_s14, %s1033_s12 }
 0x2e1   : > { %p1036_p11 = pneg %p1035_p10  ;;  %p1042_p0 = por %p1041_p13, %p1040_p12 }
 0x2e3   : > { %p1043_p1 = pnand %p1042_p0, %p1036_p11 }
 0x356   : > { %v590_v62 = vpop.xlane.xlu0 %589 }
 0x357   : > { %v591_v63 = vrot.slane %v590_v62, 4 }
 0x359   : > { %v592_v0 = vadd.f32 %v591_v63, %v590_v62 }
 0x35b   : > { %v593_v1 = vrot.slane %v592_v0, 2 }
 0x35d   : > { %v594_v2 = vadd.f32 %v593_v1, %v592_v0 }
 0x35f   : > { %v595_v3 = vrot.slane %v594_v2, 1 }
 0x361   : > { %v596_v4 = vadd.f32 %v595_v3, %v594_v2 }
 0x363   : > { %888 = vpush %v596_v4 }
 0x394   : > { %s889_s30 = spop %888 }
 0x395   : > { %v603_v6 = vstv %s889_s30 }
 0x396   : > { %v604_v7 = vsel %vm602_vm8, %v603_v6, 0.0 }
 0x397   : > { %605 = vst [vmem:[%s227_s6] sm:$0xff] %v604_v7 }
 0x398   : > { %1046 = shalt.err (!%p1043_p1)
}
 0x399   : > { %s1047_s19 = scalar_lea.hbm %s1302_s10, 128  ;;  %s1051_s20 = scalar_lea.hbm %s1342_s4, 256 }
 0x39a   : > { %p1048_p2 = scmp.ne.s32.totalorder %s1302_s10, %s1047_s19  ;;  %p1052_p7 = scmp.lt.s32.totalorder %s1302_s10, %s1342_s4 }
 0x39b   : > { %p1053_p8 = scmp.lt.s32.totalorder %s1051_s20, %s1047_s19 }
 0x39c   : > { %p1049_p3 = pnand %p1048_p2, %p1175_p5 }
 0x39d   : > { %p1054_p6 = por %p1053_p8, %p1052_p7 }
 0x39e   : > { %p1050_p4 = pneg %p1049_p3 }
 0x3a0   : > { %p1055_p9 = pnand %p1054_p6, %p1050_p4 }
 0x3a2   : > { %1058 = shalt.err (!%p1055_p9)
}
 0x3a3   : > { %895 = dma.vmem_to_hbm [thread:$0]  (%p1175_p5), %s639_s9, 128, %s1302_s10, %s612_s11  }
 0x3a4 PF: > { %p911_p10 = scmp.ge.s32.totalorder %s1101_s18, 2  ;;  %s650_s5 = sand.u32 1, %s1089_s15  }
 0x3a5   : > { %p1348_p11 = scmp.ne.s32.totalorder %s1344_s26, 0  ;;  %s651_s6 = scalar_lea.sflag [#allocation4], %s650_s5 }
 0x3a7   : > { %p903_p12 = pnand %p911_p10, %p1348_p11 }
 0x3a9   : > { %p904_p13 = pneg %p903_p12 }
 0x3ab   : > { %1080 = dma.done.wait (%p904_p13), %s651_s6, 128  }
 0x3ac   : > { %1082 = vsyncadd (%p904_p13), %s651_s6, 4294967168  ;;  %s660_s30 = scalar_lea.sflag [#allocation7], %s650_s5 }
 0x3ad   : > { %1084 = dma.done.wait (%p904_p13), %s660_s30, 128  }
 0x3ae   : > { %1086 = vsyncadd (%p904_p13), %s660_s30, 4294967168  ;;  %p19_p5 = scmp.ge.s32.totalorder %s1162_s21, 4   ;;  %s1349_s15 = smov %s1093_s16 }
 0x3af   : > { %s1350_s16 = smov %s1097_s17  ;;  %s1351_s17 = smov %s1173_s24 }
 0x3b0   : > { %s1352_s18 = smov %s1162_s21  ;;  %21 = sbr.rel (!%p19_p5) target bundleno = 6 (0x6), region = 94 }
 0x3b5   :  { %665 = vsyncpa [#allocation3], 1 }
 0x3b6   :  { %667 = vsyncpa [#allocation3 + $0x1], 1 }
 0x3b7   :  { %668 = vsyncpa [#allocation4], 1 }
 0x3b8   :  { %670 = vsyncpa [#allocation4 + $0x1], 1 }
 0x3b9   :  { %671 = vsyncpa [#allocation7], 1 }
 0x3ba   :  { %673 = vsyncpa [#allocation7 + $0x1], 1 }

</bundles_post_ra>
